<compile_context>
chip_gen: v5e
topology: v5e:2x2
jax: 0.10.0
libtpu: 0.0.40
codegen_flags: <defaults>
</compile_context>

<pallas_src>
import functools

import jax
import jax.numpy as jnp
from jax.experimental import pallas as pl
from jax.experimental.pallas import tpu as pltpu


def _round_up(x, m):
    return ((x + m - 1) // m) * m


# ----------------------------- Pallas kernels ------------------------------ #

def _resblock_val_kernel(has_shortcut, mm_dtype,
                         x_ref, w0_ref, b0_ref, w1_ref, b1_ref, *rest):
    """forwardValOnly: out = shortcut(x) + fc_1(relu(fc_0(relu(x))))."""
    if has_shortcut:
        ws_ref, o_ref = rest
    else:
        (o_ref,) = rest
    x = x_ref[...].astype(jnp.float32)                              # [tn, C_in]
    h0 = jnp.maximum(x, 0.0).astype(mm_dtype)
    net = jnp.dot(h0, w0_ref[...],
                  preferred_element_type=jnp.float32) + b0_ref[...]  # [tn, C_h]
    h1 = jnp.maximum(net, 0.0).astype(mm_dtype)
    dx = jnp.dot(h1, w1_ref[...],
                 preferred_element_type=jnp.float32) + b1_ref[...]   # [tn, C_out]
    if has_shortcut:
        x_s = jnp.dot(x.astype(mm_dtype), ws_ref[...],
                      preferred_element_type=jnp.float32)
    else:
        x_s = x                                                      # C_in == C_out
    o_ref[...] = (x_s + dx).astype(o_ref.dtype)


def _resblock_grad_kernel(has_shortcut, mm_dtype,
                          x_ref, sel_in_ref, sel_h_ref,
                          w0_ref, b0_ref, w1_ref, b1_ref, *rest):
    """forwardGradTrack on the K-interleaved flat layout [tn, C*K].

    * Linear layers use kron-expanded weights kron(W^T, I_K), so value + grad
      slots are handled by one matmul and the data never leaves the [tn, C*K]
      lane-dense layout (no transpose / concatenate).
    * Biases are pre-baked into [1, C*K] vectors that are non-zero only on the
      value-slot lanes.
    * The ReLU-track mask (value-slot sign, broadcast over K) is produced with
      a 0/1 selector matmul kron(I_C, E) on (x > 0); its outputs are exactly
      0/1 in any matmul precision.
    """
    if has_shortcut:
        ws_ref, o_ref = rest
    else:
        (o_ref,) = rest
    x = x_ref[...].astype(jnp.float32)                               # [tn, C_in*K]

    # --- ReLU grad-track #1: mask from value slot, broadcast across K --------
    step_x = (x > 0.0).astype(jnp.float32)
    m1 = jnp.dot(step_x, sel_in_ref[...], preferred_element_type=jnp.float32)
    a = x * m1                                                       # relu on val, gated grads

    # --- fc_0 (bias only on value-slot lanes, baked into b0_flat) ------------
    net = jnp.dot(a.astype(mm_dtype), w0_ref[...],
                  preferred_element_type=jnp.float32) + b0_ref[...]  # [tn, C_h*K]

    # --- ReLU grad-track #2 ---------------------------------------------------
    step_n = (net > 0.0).astype(jnp.float32)
    m2 = jnp.dot(step_n, sel_h_ref[...], preferred_element_type=jnp.float32)
    b = net * m2

    # --- fc_1 ------------------------------------------------------------------
    dx = jnp.dot(b.astype(mm_dtype), w1_ref[...],
                 preferred_element_type=jnp.float32) + b1_ref[...]   # [tn, C_out*K]

    # --- shortcut (no bias, no activation) -------------------------------------
    if has_shortcut:
        xs = jnp.dot(x.astype(mm_dtype), ws_ref[...],
                     preferred_element_type=jnp.float32)
    else:
        xs = x                                                       # identity (C_in == C_out)

    o_ref[...] = (xs + dx).astype(o_ref.dtype)


# ------------------------------ Python wrapper ----------------------------- #

class ResnetBlockFCPallas:
    """Pallas re-implementation of ResnetBlockFC.forward (valOnly & gradTrack)."""

    def __init__(self, size_in, size_out=None, size_h=None, beta=0.0, *,
                 key, tile_n=1024, matmul_dtype=jnp.float32):
        if size_out is None:
            size_out = size_in
        if size_h is None:
            size_h = min(size_in, size_out)
        if beta > 0:
            # TODO(synk): Softplus (beta>0) branch raises in the PyTorch module too.
            raise NotImplementedError
        self.size_in, self.size_h, self.size_out = size_in, size_h, size_out
        self.tile_n = tile_n
        self.matmul_dtype = matmul_dtype

        k0, k1, k2, k3, k4 = jax.random.split(key, 5)
        # Parameter shapes follow the PyTorch module (nn.Linear weight is [out, in]).
        # NOTE: the module zero-inits fc_1.weight and both biases (kaiming for fc_0 /
        # shortcut); here we use small deterministic random values so every compute
        # path is numerically exercised by the correctness check below.
        f32 = jnp.float32
        self.w0 = jax.random.normal(k0, (size_h, size_in), f32) * (2.0 / size_in) ** 0.5
        self.b0 = jax.random.normal(k1, (size_h,), f32) * 0.1
        self.w1 = jax.random.normal(k2, (size_out, size_h), f32) * 0.05
        self.b1 = jax.random.normal(k3, (size_out,), f32) * 0.1
        if size_in == size_out:
            self.ws = None                             # identity shortcut
        else:
            self.ws = jax.random.normal(k4, (size_out, size_in), f32) * (2.0 / size_in) ** 0.5

        # valOnly weights: transposed once, unpadded (block == full array is legal),
        # cast to the matmul operand dtype; biases stay f32.
        self.w0t = self.w0.T.astype(matmul_dtype)                    # [C_in, C_h]
        self.w1t = self.w1.T.astype(matmul_dtype)                    # [C_h, C_out]
        self.b0_2d = self.b0[None, :]                                # [1, C_h]  f32
        self.b1_2d = self.b1[None, :]                                # [1, C_out] f32
        self.wst = self.ws.T.astype(matmul_dtype) if self.ws is not None else None

        # jit the wrappers so the (free) reshape glue fuses with the caller.
        self._val_jit = jax.jit(self._forward_val_only)
        self._grad_jit = jax.jit(self._forward_grad_track)

    # -- dispatcher mirroring the PyTorch forward(x, forwardMode) -------------
    def forward(self, x, forwardMode):
        if forwardMode in ['valOnly']:
            return self._val_jit(x)
        elif forwardMode in ['gradTrack']:
            return self._grad_jit(x)
        else:
            raise NotImplementedError('Unknown forwardMode: %s' % forwardMode)

    # -- helpers ----------------------------------------------------------------
    def _pick_tile(self, n):
        tn = min(self.tile_n, _round_up(n, 8))       # sublane multiple of 8
        if n > 8:
            # keep >=2 grid steps where possible so both v7x TensorCores get work
            tn = min(tn, _round_up(pl.cdiv(n, 2), 8))
        return max(8, tn)

    def _compiler_params(self):
        return pltpu.CompilerParams(
            dimension_semantics=("parallel",),
            vmem_limit_bytes=32 * 1024 * 1024,
        )

    # -- forwardValOnly ----------------------------------------------------------
    def _forward_val_only(self, x):
        n, c_in = x.shape
        assert c_in == self.size_in
        tn = self._pick_tile(n)
        has_sc = self.wst is not None
        w_args = [self.w0t, self.b0_2d, self.w1t, self.b1_2d]
        if has_sc:
            w_args.append(self.wst)
        w_specs = [pl.BlockSpec(a.shape, lambda i: (0, 0)) for a in w_args]
        out = pl.pallas_call(
            functools.partial(_resblock_val_kernel, has_sc, self.matmul_dtype),
            out_shape=jax.ShapeDtypeStruct((n, self.size_out), x.dtype),
            grid_spec=pltpu.PrefetchScalarGridSpec(
                num_scalar_prefetch=0,
                grid=(pl.cdiv(n, tn),),
                in_specs=[pl.BlockSpec((tn, c_in), lambda i: (i, 0))] + w_specs,
                out_specs=pl.BlockSpec((tn, self.size_out), lambda i: (i, 0)),
            ),
            compiler_params=self._compiler_params(),
        )(x, *w_args)
        return out

    # -- forwardGradTrack ---------------------------------------------------------
    def _expanded_weights(self, k):
        """kron-expanded weights / biases / mask selectors for the [N, C*K] layout."""
        f32 = jnp.float32
        eye_k = jnp.eye(k, dtype=f32)
        e_first = jnp.zeros((k, k), f32).at[0, :].set(1.0)   # E[r, s] = [r == 0]
        e0 = jnp.zeros((k,), f32).at[0].set(1.0)
        sel_in = jnp.kron(jnp.eye(self.size_in, dtype=f32), e_first)   # [Cin*K, Cin*K]
        sel_h = jnp.kron(jnp.eye(self.size_h, dtype=f32), e_first)     # [Ch*K,  Ch*K]
        w0e = jnp.kron(self.w0.T, eye_k).astype(self.matmul_dtype)     # [Cin*K, Ch*K]
        w1e = jnp.kron(self.w1.T, eye_k).astype(self.matmul_dtype)     # [Ch*K,  Cout*K]
        b0e = jnp.kron(self.b0, e0)[None, :]                           # [1, Ch*K]   f32
        b1e = jnp.kron(self.b1, e0)[None, :]                           # [1, Cout*K] f32
        wse = (jnp.kron(self.ws.T, eye_k).astype(self.matmul_dtype)
               if self.ws is not None else None)                       # [Cin*K, Cout*K]
        return sel_in, sel_h, w0e, b0e, w1e, b1e, wse

    def _forward_grad_track(self, x4):
        n, c_in, k = x4.shape
        assert c_in == self.size_in
        tn = self._pick_tile(n)
        x_flat = x4.reshape(n, c_in * k)            # contiguous reshape: no HBM pass
        sel_in, sel_h, w0e, b0e, w1e, b1e, wse = self._expanded_weights(k)
        has_sc = wse is not None
        w_args = [sel_in, sel_h, w0e, b0e, w1e, b1e]
        if has_sc:
            w_args.append(wse)
        w_specs = [pl.BlockSpec(a.shape, lambda i: (0, 0)) for a in w_args]
        c_out_k = self.size_out * k
        out_flat = pl.pallas_call(
            functools.partial(_resblock_grad_kernel, has_sc, self.matmul_dtype),
            out_shape=jax.ShapeDtypeStruct((n, c_out_k), x4.dtype),
            grid_spec=pltpu.PrefetchScalarGridSpec(
                num_scalar_prefetch=0,
                grid=(pl.cdiv(n, tn),),
                in_specs=[pl.BlockSpec((tn, c_in * k), lambda i: (i, 0))] + w_specs,
                out_specs=pl.BlockSpec((tn, c_out_k), lambda i: (i, 0)),
            ),
            compiler_params=self._compiler_params(),
        )(x_flat, *w_args)
        return out_flat.reshape(n, self.size_out, k)  # back to PyTorch layout [N, C_out, K]


# ------------------------- plain-JAX reference path ------------------------ #

def ref_val_only(blk, x):
    net = jnp.maximum(x, 0.0) @ blk.w0.T + blk.b0
    dx = jnp.maximum(net, 0.0) @ blk.w1.T + blk.b1
    x_s = x @ blk.ws.T if blk.ws is not None else x
    return x_s + dx


def ref_grad_track(blk, x4):
    def relu_t(a):
        step = (a[..., :1] > 0).astype(a.dtype)
        return a * step

    def lin_t(w, b, a):
        val = a[..., 0] @ w.T
        if b is not None:
            val = val + b
        grad = jnp.einsum('oi,nig->nog', w, a[..., 1:])
        return jnp.concatenate([val[..., None], grad], axis=-1)

    net4 = lin_t(blk.w0, blk.b0, relu_t(x4))
    dx4 = lin_t(blk.w1, blk.b1, relu_t(net4))
    xs4 = lin_t(blk.ws, None, x4) if blk.ws is not None else x4
    return xs4 + dx4


# ----------------------------------- main ----------------------------------- #

if __name__ == "__main__":
    key = jax.random.PRNGKey(0)
    k_x, k_x4, k_a, k_b, k_c = jax.random.split(key, 5)

    N, C_IN, C_OUT, K = 300, 32, 48, 4   # K = 1 value slot + 3 gradient slots

    # block_a: linear shortcut, default tile_n (ragged boundary block exercised).
    block_a = ResnetBlockFCPallas(C_IN, C_OUT, key=k_a)
    # block_b: identity shortcut, small tile so a multi-step grid is exercised.
    block_b = ResnetBlockFCPallas(C_IN, key=k_b, tile_n=64)
    # block_c: bf16 MXU-operand path (f32 accumulation & masks).
    block_c = ResnetBlockFCPallas(C_IN, C_OUT, key=k_c, matmul_dtype=jnp.bfloat16)

    x = jax.random.normal(k_x, (N, C_IN), jnp.float32)
    x4 = jax.random.normal(k_x4, (N, C_IN, K), jnp.float32)

    for blk in (block_a, block_b):
        out_v = jax.block_until_ready(blk.forward(x, 'valOnly'))
        out_g = jax.block_until_ready(blk.forward(x4, 'gradTrack'))
        with jax.default_matmul_precision("highest"):
            ref_v = ref_val_only(blk, x)
            ref_g = ref_grad_track(blk, x4)
        assert out_v.shape == (N, blk.size_out)
        assert out_g.shape == (N, blk.size_out, K)
        assert jnp.allclose(out_v, ref_v, rtol=1e-2, atol=1e-2)
        assert jnp.allclose(out_g, ref_g, rtol=1e-2, atol=1e-2)

    # bf16-operand path: valOnly checked loosely against the f32 reference;
    # gradTrack is a smoke test (bf16 can flip ReLU masks on near-zero
    # pre-activations, so an elementwise f32 comparison is not meaningful).
    out_v = jax.block_until_ready(block_c.forward(x, 'valOnly'))
    out_g = jax.block_until_ready(block_c.forward(x4, 'gradTrack'))
    with jax.default_matmul_precision("highest"):
        ref_v = ref_val_only(block_c, x)
    assert out_v.shape == (N, block_c.size_out)
    assert jnp.allclose(out_v, ref_v, rtol=5e-2, atol=5e-2)
    assert out_g.shape == (N, block_c.size_out, K)
    assert bool(jnp.all(jnp.isfinite(out_g)))

    print("KERNEL_OK")
</pallas_src>

<mosaic_0001>
module attributes {stable_mosaic.version = 11 : i64} {
  func.func @_resblock_val_kernel(%arg0: i32, %arg1: memref<152x32xf32, #tpu.memory_space<vmem>>, %arg2: memref<32x32xf32, #tpu.memory_space<vmem>>, %arg3: memref<1x32xf32, #tpu.memory_space<vmem>>, %arg4: memref<32x48xf32, #tpu.memory_space<vmem>>, %arg5: memref<1x48xf32, #tpu.memory_space<vmem>>, %arg6: memref<32x48xf32, #tpu.memory_space<vmem>>, %arg7: memref<152x48xf32, #tpu.memory_space<vmem>>) attributes {dimension_semantics = [#tpu.dimension_semantics<parallel>], iteration_bounds = array<i64: 2>, scalar_prefetch = 0 : i64, scratch_operands = 0 : i64, tpu.core_type = #tpu.core_type<tc>, window_params = [{transform_indices = @transform_0, window_bounds = array<i64: 152, 32>}, {pipeline_mode = #tpu.pipeline_mode<synchronous>, transform_indices = @transform_1, window_bounds = array<i64: 32, 32>}, {pipeline_mode = #tpu.pipeline_mode<synchronous>, transform_indices = @transform_2, window_bounds = array<i64: 1, 32>}, {pipeline_mode = #tpu.pipeline_mode<synchronous>, transform_indices = @transform_3, window_bounds = array<i64: 32, 48>}, {pipeline_mode = #tpu.pipeline_mode<synchronous>, transform_indices = @transform_4, window_bounds = array<i64: 1, 48>}, {pipeline_mode = #tpu.pipeline_mode<synchronous>, transform_indices = @transform_5, window_bounds = array<i64: 32, 48>}, {transform_indices = @transform_6, window_bounds = array<i64: 152, 48>}]} {
    %c0 = arith.constant 0 : index
    %c0_0 = arith.constant 0 : index
    %0 = vector.load %arg1[%c0, %c0_0] : memref<152x32xf32, #tpu.memory_space<vmem>>, vector<152x32xf32>
    %cst = arith.constant 0.000000e+00 : f32
    %1 = vector.broadcast %cst : f32 to vector<152x32xf32>
    %2 = arith.maximumf %0, %1 : vector<152x32xf32>
    %c0_1 = arith.constant 0 : index
    %c0_2 = arith.constant 0 : index
    %3 = vector.load %arg2[%c0_1, %c0_2] : memref<32x32xf32, #tpu.memory_space<vmem>>, vector<32x32xf32>
    %cst_3 = arith.constant dense<0.000000e+00> : vector<152x32xf32>
    %4 = tpu.matmul %2, %3, %cst_3 {dimension_numbers = #tpu.dot_dimension_numbers<[1], [0], [0], [1], [0, 0, 1, 1], [], []>} : vector<152x32xf32>, vector<32x32xf32>, vector<152x32xf32> -> vector<152x32xf32>
    %c0_4 = arith.constant 0 : index
    %c0_5 = arith.constant 0 : index
    %5 = vector.load %arg3[%c0_4, %c0_5] : memref<1x32xf32, #tpu.memory_space<vmem>>, vector<1x32xf32>
    %6 = vector.broadcast %5 : vector<1x32xf32> to vector<152x32xf32>
    %7 = arith.addf %4, %6 : vector<152x32xf32>
    %cst_6 = arith.constant 0.000000e+00 : f32
    %8 = vector.broadcast %cst_6 : f32 to vector<152x32xf32>
    %9 = arith.maximumf %7, %8 : vector<152x32xf32>
    %c0_7 = arith.constant 0 : index
    %c0_8 = arith.constant 0 : index
    %10 = vector.load %arg4[%c0_7, %c0_8] : memref<32x48xf32, #tpu.memory_space<vmem>>, vector<32x48xf32>
    %cst_9 = arith.constant dense<0.000000e+00> : vector<152x48xf32>
    %11 = tpu.matmul %9, %10, %cst_9 {dimension_numbers = #tpu.dot_dimension_numbers<[1], [0], [0], [1], [0, 0, 1, 1], [], []>} : vector<152x32xf32>, vector<32x48xf32>, vector<152x48xf32> -> vector<152x48xf32>
    %c0_10 = arith.constant 0 : index
    %c0_11 = arith.constant 0 : index
    %12 = vector.load %arg5[%c0_10, %c0_11] : memref<1x48xf32, #tpu.memory_space<vmem>>, vector<1x48xf32>
    %13 = vector.broadcast %12 : vector<1x48xf32> to vector<152x48xf32>
    %14 = arith.addf %11, %13 : vector<152x48xf32>
    %c0_12 = arith.constant 0 : index
    %c0_13 = arith.constant 0 : index
    %15 = vector.load %arg6[%c0_12, %c0_13] : memref<32x48xf32, #tpu.memory_space<vmem>>, vector<32x48xf32>
    %cst_14 = arith.constant dense<0.000000e+00> : vector<152x48xf32>
    %16 = tpu.matmul %0, %15, %cst_14 {dimension_numbers = #tpu.dot_dimension_numbers<[1], [0], [0], [1], [0, 0, 1, 1], [], []>} : vector<152x32xf32>, vector<32x48xf32>, vector<152x48xf32> -> vector<152x48xf32>
    %17 = arith.addf %16, %14 : vector<152x48xf32>
    %c0_15 = arith.constant 0 : index
    %c0_16 = arith.constant 0 : index
    %18 = vector.load %arg7[%c0_15, %c0_16] : memref<152x48xf32, #tpu.memory_space<vmem>>, vector<152x48xf32>
    tpu.vector_store %arg7[%c0_15, %c0_16], %17 {strides = array<i32>} : memref<152x48xf32, #tpu.memory_space<vmem>>, vector<152x48xf32>,
    return
  }
  func.func @transform_0(%arg0: i32) -> (i32, i32) {
    %c0_i32 = arith.constant 0 : i32
    %c0_i32_0 = arith.constant 0 : i32
    return %arg0, %c0_i32 : i32, i32
  }
  func.func @transform_1(%arg0: i32) -> (i32, i32) {
    %c0_i32 = arith.constant 0 : i32
    %c0_i32_0 = arith.constant 0 : i32
    %c0_i32_1 = arith.constant 0 : i32
    return %c0_i32, %c0_i32_0 : i32, i32
  }
  func.func @transform_2(%arg0: i32) -> (i32, i32) {
    %c0_i32 = arith.constant 0 : i32
    %c0_i32_0 = arith.constant 0 : i32
    %c0_i32_1 = arith.constant 0 : i32
    return %c0_i32, %c0_i32_0 : i32, i32
  }
  func.func @transform_3(%arg0: i32) -> (i32, i32) {
    %c0_i32 = arith.constant 0 : i32
    %c0_i32_0 = arith.constant 0 : i32
    %c0_i32_1 = arith.constant 0 : i32
    return %c0_i32, %c0_i32_0 : i32, i32
  }
  func.func @transform_4(%arg0: i32) -> (i32, i32) {
    %c0_i32 = arith.constant 0 : i32
    %c0_i32_0 = arith.constant 0 : i32
    %c0_i32_1 = arith.constant 0 : i32
    return %c0_i32, %c0_i32_0 : i32, i32
  }
  func.func @transform_5(%arg0: i32) -> (i32, i32) {
    %c0_i32 = arith.constant 0 : i32
    %c0_i32_0 = arith.constant 0 : i32
    %c0_i32_1 = arith.constant 0 : i32
    return %c0_i32, %c0_i32_0 : i32, i32
  }
  func.func @transform_6(%arg0: i32) -> (i32, i32) {
    %c0_i32 = arith.constant 0 : i32
    %c0_i32_0 = arith.constant 0 : i32
    return %arg0, %c0_i32 : i32, i32
  }
}

</mosaic_0001>

<bundles_post_ra>
// kernel: _forward_val_only.1
= control target key start
LH: loop header
LB: loop body
LE: loop exit
PB: predicated region body
PF: predicated region fallthrough
CT: control target
= control target key end

     0   :  { %s933_s21 = smov 0   ;;  %s1235_s0 = inlined_call_operand.vmem [shape: f32[300,32], index: 0, kind: input, shape index: {}]   ;;  %s1236_s1 = inlined_call_operand.vmem [shape: f32[32,32], index: 1, kind: input, shape index: {}]   ;;  %s1237_s2 = inlined_call_operand.vmem [shape: f32[1,32], index: 2, kind: input, shape index: {}]   ;;  %s1238_s3 = inlined_call_operand.vmem [shape: f32[32,48], index: 3, kind: input, shape index: {}]   ;;  %s1239_s4 = inlined_call_operand.vmem [shape: f32[1,48], index: 4, kind: input, shape index: {}]   ;;  %s1240_s5 = inlined_call_operand.vmem [shape: f32[32,48], index: 5, kind: input, shape index: {}]   ;;  %s1241_s6 = inlined_call_operand.vmem [shape: f32[300,48], index: 6, kind: output, shape index: {}]  }
   0x1 LB: > { %s802_s22 = sadd.s32 4294967295, %s896_s21   ;;  %p806_p0 = scmp.ge.s32.totalorder %s896_s21, 1  ;;  %s896_s21 = sphi %s933_s21, %s16_s21  }
   0x2   : > { %p213_p1 = scmp.lt.s32.totalorder %s896_s21, 3 }
   0x4   : > { %p214_p2 = pnand %p806_p0, %p213_p1 }
   0x5   : > { %s243_s27 = smul.u32 (!%p214_p2), 19, %s802_s22 }
   0x6   : > { %217 = sbr.rel (%p214_p2) target bundleno = 392 (0x188), region = 44 }
   0x7   : > { %p244_p3 = scmp.lt.s32.totalorder (!%p214_p2), %s243_s27, 37 }
   0xb   : > { %v296_v0 = vld [vmem:[%s1236_s1 + $0x18] sm:$0xff]  ;;  %v295_v1 = vld [vmem:[%s1236_s1 + $0x10] sm:$0xff]  ;;  %v294_v2 = vld [vmem:[%s1236_s1 + $0x8] sm:$0xff]  ;;  %s1243_s27 = smov (!%p244_p3, %s243_s27), 37  ;;  %vm301_vm0 = vcmask 261120   ;;  %vm726_vm1 = vcmask 392192  }
   0xc   : > { %371 = vmatpush.msra.mxu0 %v296_v0  ;;  %868 = vmatpush.msra.mxu3 %v296_v0  ;;  %v293_v3 = vld [vmem:[%s1236_s1] sm:$0xff]  ;;  %s807_s8 = sshll.u32 %s1243_s27, 3  ;;  %v594_v34 = vld [vmem:[%s1240_s5 + $0x18] sm:$0xff]  ;;  %v593_v35 = vld [vmem:[%s1240_s5 + $0x10] sm:$0xff] }
   0xd   : > { %s961_s11 = scalar_lea.vmem %s1235_s0, %s807_s8  ;;  %v455_v36 = vld [vmem:[%s1238_s3 + $0x18] sm:$0xff]  ;;  %664 = vmatpush.msra.mxu2 %v594_v34  ;;  %v592_v38 = vld [vmem:[%s1240_s5 + $0x8] sm:$0xff]  ;;  %v454_v42 = vld [vmem:[%s1238_s3 + $0x10] sm:$0xff]  ;;  %s1174_s13 = scalar_lea.vmem %s1241_s6, %s807_s8 }
   0xe   : > { %372 = vmatpush.msra.mxu0 %v295_v1  ;;  %869 = vmatpush.msra.mxu3 %v295_v1  ;;  %v964_v4 = vld [vmem:[%s961_s11] sm:$0xff]  ;;  %v968_v6 = vld [vmem:[%s961_s11 + $0x78] sm:$0xff]  ;;  %v973_v8 = vld [vmem:[%s961_s11 + $0x8] sm:$0xff] }
   0xf   : > { %v274_v5 = vmax.f32 %v964_v4, 0.0  ;;  %v289_v7 = vmax.f32 %v968_v6, 0.0  ;;  %v977_v9 = vld [vmem:[%s961_s11 + $0x80] sm:$0xff]  ;;  %v275_v10 = vmax.f32 %v973_v8, 0.0  ;;  %v983_v12 = vld [vmem:[%s961_s11 + $0x10] sm:$0xff]  ;;  %v987_v13 = vld [vmem:[%s961_s11 + $0x88] sm:$0xff]  ;;  %529 = vmatpush.msra.mxu1 %v455_v36  ;;  %665 = vmatpush.msra.mxu2 %v593_v35 }
  0x10   : > { %373 = vmatpush.msra.mxu0 %v294_v2  ;;  %870 = vmatpush.msra.mxu3 %v294_v2  ;;  %v290_v11 = vmax.f32 %v977_v9, 0.0  ;;  %v276_v14 = vmax.f32 %v983_v12, 0.0  ;;  %v291_v15 = vmax.f32 %v987_v13, 0.0  ;;  %v993_v16 = vld [vmem:[%s961_s11 + $0x18] sm:$0xff]  ;;  %v997_v17 = vld [vmem:[%s961_s11 + $0x90] sm:$0xff]  ;;  %v1003_v20 = vld [vmem:[%s961_s11 + $0x20] sm:$0xff] }
  0x11   : > { %v277_v18 = vmax.f32 %v993_v16, 0.0  ;;  %v292_v19 = vmax.f32 %v997_v17, 0.0  ;;  %v278_v21 = vmax.f32 %v1003_v20, 0.0  ;;  %v1009_v22 = vld [vmem:[%s961_s11 + $0x28] sm:$0xff]  ;;  %v1014_v24 = vld [vmem:[%s961_s11 + $0x30] sm:$0xff]  ;;  %v1019_v26 = vld [vmem:[%s961_s11 + $0x38] sm:$0xff]  ;;  %666 = vmatpush.msra.mxu2 %v592_v38  ;;  %530 = vmatpush.msra.mxu1 %v454_v42 }
  0x12   : > { %374 = vmatpush.msra.mxu0 %v293_v3  ;;  %871 = vmatpush.msra.mxu3 %v293_v3  ;;  %v279_v23 = vmax.f32 %v1009_v22, 0.0  ;;  %v280_v25 = vmax.f32 %v1014_v24, 0.0  ;;  %v281_v27 = vmax.f32 %v1019_v26, 0.0  ;;  %v1024_v28 = vld [vmem:[%s961_s11 + $0x40] sm:$0xff]  ;;  %v1029_v30 = vld [vmem:[%s961_s11 + $0x48] sm:$0xff]  ;;  %v1034_v32 = vld [vmem:[%s961_s11 + $0x50] sm:$0xff] }
  0x13   : > { %809 = vmatmul.msk.f32.vlgmr.msra.gmra.mxu0 %vm301_vm0, %v274_v5  ;;  %824 = vmatmul.msk.f32.vlgmr.msra.gmra.mxu3 %vm301_vm0, %v289_v7  ;;  %v282_v29 = vmax.f32 %v1024_v28, 0.0  ;;  %v283_v31 = vmax.f32 %v1029_v30, 0.0  ;;  %v284_v33 = vmax.f32 %v1034_v32, 0.0  ;;  %v1048_v37 = vld [vmem:[%s961_s11 + $0x58] sm:$0xff]  ;;  %v1056_v40 = vld [vmem:[%s961_s11 + $0x60] sm:$0xff]  ;;  %v453_v44 = vld [vmem:[%s1238_s3 + $0x8] sm:$0xff] }
  0x14   : > { %872 = vmatpush.msrb.mxu3 %v455_v36  ;;  %v285_v39 = vmax.f32 %v1048_v37, 0.0  ;;  %v286_v41 = vmax.f32 %v1056_v40, 0.0  ;;  %v591_v43 = vld [vmem:[%s1240_s5] sm:$0xff]  ;;  %531 = vmatpush.msra.mxu1 %v453_v44  ;;  %v1075_v46 = vld [vmem:[%s961_s11 + $0x68] sm:$0xff]  ;;  %v1082_v48 = vld [vmem:[%s961_s11 + $0x70] sm:$0xff] }
  0x15   : > { %667 = vmatpush.msra.mxu2 %v591_v43  ;;  %v452_v45 = vld [vmem:[%s1238_s3] sm:$0xff]  ;;  %v287_v47 = vmax.f32 %v1075_v46, 0.0  ;;  %v288_v49 = vmax.f32 %v1082_v48, 0.0 }
  0x16   : > { %847 = vmatmul.msk.f32.vlgmr.msra.gmra.mxu2 %vm301_vm0, %v964_v4  ;;  %873 = vmatpush.msrb.mxu3 %v454_v42  ;;  %v1093_v50 = vld [vmem:[%s1237_s2] ss:$0 sm:$0xff] }
  0x17   : > { %532 = vmatpush.msra.mxu1 %v452_v45 }
  0x18   : > { %874 = vmatpush.msrb.mxu3 %v453_v44 }
  0x1a   : > { %875 = vmatpush.msrb.mxu3 %v452_v45 }
  0x1b   : > { %810 = vmatmul.msk.f32.gmra.mxu0 %vm301_vm0, %v275_v10  ;;  %825 = vmatmul.msk.f32.gmra.mxu3 %vm301_vm0, %v290_v11 }
  0x1c   : > { %876 = vmatpush.msra.mxu3 %v594_v34 }
  0x1e   : > { %877 = vmatpush.msra.mxu3 %v593_v35  ;;  %848 = vmatmul.msk.f32.gmra.mxu2 %vm301_vm0, %v973_v8 }
  0x20   : > { %878 = vmatpush.msra.mxu3 %v592_v38 }
  0x22   : > { %879 = vmatpush.msra.mxu3 %v591_v43 }
  0x23   : > { %811 = vmatmul.msk.f32.gmra.mxu0 %vm301_vm0, %v276_v14  ;;  %826 = vmatmul.msk.f32.gmra.mxu3 %vm301_vm0, %v291_v15 }
  0x26   : > { %849 = vmatmul.msk.f32.gmra.mxu2 %vm301_vm0, %v983_v12 }
  0x2b   : > { %812 = vmatmul.msk.f32.gmra.mxu0 %vm301_vm0, %v277_v18  ;;  %827 = vmatmul.msk.f32.gmra.mxu3 %vm301_vm0, %v292_v19 }
  0x2e   : > { %850 = vmatmul.msk.f32.gmra.mxu2 %vm301_vm0, %v993_v16 }
  0x33   : > { %813 = vmatmul.msk.f32.gmra.mxu0 %vm301_vm0, %v278_v21 }
  0x36   : > { %851 = vmatmul.msk.f32.gmra.mxu2 %vm301_vm0, %v1003_v20 }
  0x3b   : > { %814 = vmatmul.msk.f32.gmra.mxu0 %vm301_vm0, %v279_v23 }
  0x3e   : > { %852 = vmatmul.msk.f32.gmra.mxu2 %vm301_vm0, %v1009_v22 }
  0x43   : > { %815 = vmatmul.msk.f32.gmra.mxu0 %vm301_vm0, %v280_v25 }
  0x46   : > { %853 = vmatmul.msk.f32.gmra.mxu2 %vm301_vm0, %v1014_v24 }
  0x4b   : > { %816 = vmatmul.msk.f32.gmra.mxu0 %vm301_vm0, %v281_v27 }
  0x4e   : > { %854 = vmatmul.msk.f32.gmra.mxu2 %vm301_vm0, %v1019_v26 }
  0x53   : > { %817 = vmatmul.msk.f32.gmra.mxu0 %vm301_vm0, %v282_v29 }
  0x56   : > { %855 = vmatmul.msk.f32.gmra.mxu2 %vm301_vm0, %v1024_v28 }
  0x5b   : > { %818 = vmatmul.msk.f32.gmra.mxu0 %vm301_vm0, %v283_v31 }
  0x5e   : > { %856 = vmatmul.msk.f32.gmra.mxu2 %vm301_vm0, %v1029_v30 }
  0x63   : > { %819 = vmatmul.msk.f32.gmra.mxu0 %vm301_vm0, %v284_v33 }
  0x66   : > { %857 = vmatmul.msk.f32.gmra.mxu2 %vm301_vm0, %v1034_v32 }
  0x6b   : > { %820 = vmatmul.msk.f32.gmra.mxu0 %vm301_vm0, %v285_v39 }
  0x6e   : > { %858 = vmatmul.msk.f32.gmra.mxu2 %vm301_vm0, %v1048_v37 }
  0x73   : > { %821 = vmatmul.msk.f32.gmra.mxu0 %vm301_vm0, %v286_v41 }
  0x76   : > { %859 = vmatmul.msk.f32.gmra.mxu2 %vm301_vm0, %v1056_v40 }
  0x7b   : > { %822 = vmatmul.msk.f32.gmra.mxu0 %vm301_vm0, %v287_v47  ;;  %v1166_v47 = vld [vmem:[%s1239_s4] ss:$0 sm:$0xff] }
  0x7e   : > { %860 = vmatmul.msk.f32.gmra.mxu2 %vm301_vm0, %v1075_v46 }
  0x83   : > { %823 = vmatmul.msk.f32.gmra.mxu0 %vm301_vm0, %v288_v49 }
  0x86   : > { %861 = vmatmul.msk.f32.gmra.mxu2 %vm301_vm0, %v1082_v48 }
  0x90   : > { %v376_v51 = vpop.f32.mrf.mxu0 }
  0x91   : > { %v377_v52 = vadd.f32 %v1093_v50, %v376_v51 }
  0x93   : > { %v433_v53 = vmax.f32 %v377_v52, 0.0 }
  0x95   : > { %828 = vmatmul.msk.f32.vlgmr.msra.gmra.mxu1 %vm301_vm0, %v433_v53 }
  0x96   : > { %v421_v54 = vpop.f32.mrf.mxu3 }
  0x97   : > { %v422_v56 = vadd.f32 %v1093_v50, %v421_v54 }
  0x98   : > { %v379_v55 = vpop.f32.mrf.mxu0 }
  0x99   : > { %v380_v57 = vadd.f32 %v1093_v50, %v379_v55  ;;  %v448_v58 = vmax.f32 %v422_v56, 0.0  ;;  %v669_v38 = vpop.f32.mrf.mxu2 }
  0x9b   : > { %v434_v59 = vmax.f32 %v380_v57, 0.0  ;;  %843 = vmatmul.msk.f32.vlgmr.msrb.gmra.mxu3 %vm301_vm0, %v448_v58 }
  0x9d   : > { %829 = vmatmul.msk.f32.gmra.mxu1 %vm301_vm0, %v434_v59 }
  0x9e   : > { %v424_v60 = vpop.f32.mrf.mxu3 }
  0x9f   : > { %v425_v62 = vadd.f32 %v1093_v50, %v424_v60 }
  0xa0   : > { %v382_v61 = vpop.f32.mrf.mxu0 }
  0xa1   : > { %v383_v63 = vadd.f32 %v1093_v50, %v382_v61  ;;  %v449_v0 = vmax.f32 %v425_v62, 0.0  ;;  %v672_v43 = vpop.f32.mrf.mxu2 }
  0xa3   : > { %v435_v1 = vmax.f32 %v383_v63, 0.0  ;;  %844 = vmatmul.msk.f32.gmra.mxu3 %vm301_vm0, %v449_v0 }
  0xa5   : > { %830 = vmatmul.msk.f32.gmra.mxu1 %vm301_vm0, %v435_v1 }
  0xa6   : > { %v427_v2 = vpop.f32.mrf.mxu3 }
  0xa7   : > { %v428_v4 = vadd.f32 %v1093_v50, %v427_v2 }
  0xa8   : > { %v385_v3 = vpop.f32.mrf.mxu0 }
  0xa9   : > { %v386_v5 = vadd.f32 %v1093_v50, %v385_v3  ;;  %v450_v7 = vmax.f32 %v428_v4, 0.0  ;;  %v675_v46 = vpop.f32.mrf.mxu2 }
  0xab   : > { %v436_v8 = vmax.f32 %v386_v5, 0.0  ;;  %845 = vmatmul.msk.f32.gmra.mxu3 %vm301_vm0, %v450_v7 }
  0xad   : > { %831 = vmatmul.msk.f32.gmra.mxu1 %vm301_vm0, %v436_v8 }
  0xae   : > { %v430_v10 = vpop.f32.mrf.mxu3 }
  0xaf   : > { %v431_v12 = vadd.f32 %v1093_v50, %v430_v10 }
  0xb0   : > { %v388_v11 = vpop.f32.mrf.mxu0 }
  0xb1   : > { %v389_v14 = vadd.f32 %v1093_v50, %v388_v11  ;;  %v451_v15 = vmax.f32 %v431_v12, 0.0 }
  0xb3   : > { %v437_v16 = vmax.f32 %v389_v14, 0.0  ;;  %846 = vmatmul.msk.f32.gmra.mxu3 %vm301_vm0, %v451_v15 }
  0xb5   : > { %832 = vmatmul.msk.f32.gmra.mxu1 %vm301_vm0, %v437_v16 }
  0xb8   : > { %v391_v18 = vpop.f32.mrf.mxu0 }
  0xb9   : > { %v392_v19 = vadd.f32 %v1093_v50, %v391_v18 }
  0xbb   : > { %v438_v20 = vmax.f32 %v392_v19, 0.0  ;;  %862 = vmatmul.msk.f32.vlgmr.msra.gmra.mxu3 %vm301_vm0, %v968_v6 }
  0xbd   : > { %833 = vmatmul.msk.f32.gmra.mxu1 %vm301_vm0, %v438_v20 }
  0xc0   : > { %v394_v21 = vpop.f32.mrf.mxu0 }
  0xc1   : > { %v395_v22 = vadd.f32 %v1093_v50, %v394_v21 }
  0xc3   : > { %v439_v23 = vmax.f32 %v395_v22, 0.0  ;;  %863 = vmatmul.msk.f32.gmra.mxu3 %vm301_vm0, %v977_v9 }
  0xc5   : > { %834 = vmatmul.msk.f32.gmra.mxu1 %vm301_vm0, %v439_v23 }
  0xc8   : > { %v397_v24 = vpop.f32.mrf.mxu0 }
  0xc9   : > { %v398_v25 = vadd.f32 %v1093_v50, %v397_v24 }
  0xcb   : > { %v440_v6 = vmax.f32 %v398_v25, 0.0  ;;  %864 = vmatmul.msk.f32.gmra.mxu3 %vm301_vm0, %v987_v13 }
  0xcd   : > { %835 = vmatmul.msk.f32.gmra.mxu1 %vm301_vm0, %v440_v6 }
  0xd0   : > { %v400_v26 = vpop.f32.mrf.mxu0 }
  0xd1   : > { %v401_v27 = vadd.f32 %v1093_v50, %v400_v26 }
  0xd3   : > { %v441_v9 = vmax.f32 %v401_v27, 0.0  ;;  %865 = vmatmul.msk.f32.gmra.mxu3 %vm301_vm0, %v997_v17 }
  0xd5   : > { %836 = vmatmul.msk.f32.gmra.mxu1 %vm301_vm0, %v441_v9 }
  0xd8   : > { %v403_v28 = vpop.f32.mrf.mxu0 }
  0xd9   : > { %v404_v29 = vadd.f32 %v1093_v50, %v403_v28 }
  0xdb   : > { %v442_v13 = vmax.f32 %v404_v29, 0.0 }
  0xdd   : > { %837 = vmatmul.msk.f32.gmra.mxu1 %vm301_vm0, %v442_v13 }
  0xe0   : > { %v406_v30 = vpop.f32.mrf.mxu0 }
  0xe1   : > { %v407_v31 = vadd.f32 %v1093_v50, %v406_v30 }
  0xe3   : > { %v443_v32 = vmax.f32 %v407_v31, 0.0 }
  0xe5   : > { %838 = vmatmul.msk.f32.gmra.mxu1 %vm301_vm0, %v443_v32 }
  0xe8   : > { %v409_v17 = vpop.f32.mrf.mxu0 }
  0xe9   : > { %v410_v33 = vadd.f32 %v1093_v50, %v409_v17 }
  0xeb   : > { %v444_v34 = vmax.f32 %v410_v33, 0.0 }
  0xed   : > { %839 = vmatmul.msk.f32.gmra.mxu1 %vm301_vm0, %v444_v34 }
  0xf0   : > { %v412_v35 = vpop.f32.mrf.mxu0 }
  0xf1   : > { %v413_v36 = vadd.f32 %v1093_v50, %v412_v35 }
  0xf3   : > { %v445_v37 = vmax.f32 %v413_v36, 0.0 }
  0xf5   : > { %840 = vmatmul.msk.f32.gmra.mxu1 %vm301_vm0, %v445_v37 }
  0xf8   : > { %v415_v39 = vpop.f32.mrf.mxu0 }
  0xf9   : > { %v416_v40 = vadd.f32 %v1093_v50, %v415_v39 }
  0xfb   : > { %v446_v41 = vmax.f32 %v416_v40, 0.0 }
  0xfd   : > { %841 = vmatmul.msk.f32.gmra.mxu1 %vm301_vm0, %v446_v41 }
 0x100   : > { %v418_v42 = vpop.f32.mrf.mxu0 }
 0x101   : > { %v419_v44 = vadd.f32 %v1093_v50, %v418_v42  ;;  %v678_v50 = vpop.f32.mrf.mxu2 }
 0x103   : > { %v447_v45 = vmax.f32 %v419_v44, 0.0 }
 0x105   : > { %842 = vmatmul.msk.f32.gmra.mxu1 %vm301_vm0, %v447_v45 }
 0x109   : > { %v681_v55 = vpop.f32.mrf.mxu2 }
 0x111   : > { %v684_v61 = vpop.f32.mrf.mxu2 }
 0x112   : > { %v534_v48 = vpop.f32.mrf.mxu1 }
 0x113   : > { %v535_v49 = vadd.f32 %v1166_v47, %v534_v48 }
 0x115   : > { %v670_v51 = vadd.f32 %v669_v38, %v535_v49 }
 0x117   : > { %727 = vst.msk [vmem:[%s1174_s13] sm:$0xff] %vm726_vm1, %v670_v51 }
 0x119   : > { %v687_v3 = vpop.f32.mrf.mxu2 }
 0x11a   : > { %v537_v52 = vpop.f32.mrf.mxu1 }
 0x11b   : > { %v538_v53 = vadd.f32 %v1166_v47, %v537_v52 }
 0x11d   : > { %v673_v54 = vadd.f32 %v672_v43, %v538_v53 }
 0x11e   : > { %v579_v56 = vpop.f32.mrf.mxu3 }
 0x11f   : > { %728 = vst.msk [vmem:[%s1174_s13 + $0x8] sm:$0xff] %vm726_vm1, %v673_v54  ;;  %v580_v11 = vadd.f32 %v1166_v47, %v579_v56 }
 0x121   : > { %v690_v12 = vpop.f32.mrf.mxu2 }
 0x122   : > { %v540_v57 = vpop.f32.mrf.mxu1 }
 0x123   : > { %v541_v58 = vadd.f32 %v1166_v47, %v540_v57 }
 0x125   : > { %v676_v59 = vadd.f32 %v675_v46, %v541_v58 }
 0x126   : > { %v582_v60 = vpop.f32.mrf.mxu3 }
 0x127   : > { %729 = vst.msk [vmem:[%s1174_s13 + $0x10] sm:$0xff] %vm726_vm1, %v676_v59  ;;  %v583_v20 = vadd.f32 %v1166_v47, %v582_v60 }
 0x129   : > { %v693_v22 = vpop.f32.mrf.mxu2 }
 0x12a   : > { %v543_v62 = vpop.f32.mrf.mxu1 }
 0x12b   : > { %v544_v63 = vadd.f32 %v1166_v47, %v543_v62 }
 0x12d   : > { %v679_v0 = vadd.f32 %v678_v50, %v544_v63 }
 0x12e   : > { %v585_v1 = vpop.f32.mrf.mxu3 }
 0x12f   : > { %730 = vst.msk [vmem:[%s1174_s13 + $0x18] sm:$0xff] %vm726_vm1, %v679_v0  ;;  %v586_v26 = vadd.f32 %v1166_v47, %v585_v1 }
 0x131   : > { %v696_v28 = vpop.f32.mrf.mxu2 }
 0x132   : > { %v546_v2 = vpop.f32.mrf.mxu1 }
 0x133   : > { %v547_v4 = vadd.f32 %v1166_v47, %v546_v2 }
 0x135   : > { %v682_v5 = vadd.f32 %v681_v55, %v547_v4 }
 0x136   : > { %v588_v7 = vpop.f32.mrf.mxu3 }
 0x137   : > { %731 = vst.msk [vmem:[%s1174_s13 + $0x20] sm:$0xff] %vm726_vm1, %v682_v5  ;;  %v589_v31 = vadd.f32 %v1166_v47, %v588_v7 }
 0x139   : > { %v699_v35 = vpop.f32.mrf.mxu2 }
 0x13a   : > { %v549_v8 = vpop.f32.mrf.mxu1 }
 0x13b   : > { %v550_v10 = vadd.f32 %v1166_v47, %v549_v8 }
 0x13d   : > { %v685_v14 = vadd.f32 %v684_v61, %v550_v10 }
 0x13e   : > { %v714_v15 = vpop.f32.mrf.mxu3 }
 0x13f   : > { %732 = vst.msk [vmem:[%s1174_s13 + $0x28] sm:$0xff] %vm726_vm1, %v685_v14  ;;  %v715_v16 = vadd.f32 %v714_v15, %v580_v11 }
 0x141   : > { %742 = vst.msk [vmem:[%s1174_s13 + $0x78] sm:$0xff] %vm726_vm1, %v715_v16  ;;  %v702_v40 = vpop.f32.mrf.mxu2 }
 0x142   : > { %v552_v18 = vpop.f32.mrf.mxu1 }
 0x143   : > { %v553_v19 = vadd.f32 %v1166_v47, %v552_v18 }
 0x145   : > { %v688_v21 = vadd.f32 %v687_v3, %v553_v19 }
 0x146   : > { %v717_v23 = vpop.f32.mrf.mxu3 }
 0x147   : > { %733 = vst.msk [vmem:[%s1174_s13 + $0x30] sm:$0xff] %vm726_vm1, %v688_v21  ;;  %v718_v24 = vadd.f32 %v717_v23, %v583_v20 }
 0x149   : > { %743 = vst.msk [vmem:[%s1174_s13 + $0x80] sm:$0xff] %vm726_vm1, %v718_v24  ;;  %v705_v45 = vpop.f32.mrf.mxu2 }
 0x14a   : > { %v555_v25 = vpop.f32.mrf.mxu1 }
 0x14b   : > { %v556_v6 = vadd.f32 %v1166_v47, %v555_v25 }
 0x14d   : > { %v691_v27 = vadd.f32 %v690_v12, %v556_v6 }
 0x14e   : > { %v720_v9 = vpop.f32.mrf.mxu3 }
 0x14f   : > { %734 = vst.msk [vmem:[%s1174_s13 + $0x38] sm:$0xff] %vm726_vm1, %v691_v27  ;;  %v721_v29 = vadd.f32 %v720_v9, %v586_v26 }
 0x151   : > { %744 = vst.msk [vmem:[%s1174_s13 + $0x88] sm:$0xff] %vm726_vm1, %v721_v29  ;;  %v708_v50 = vpop.f32.mrf.mxu2 }
 0x152   : > { %v558_v13 = vpop.f32.mrf.mxu1 }
 0x153   : > { %v559_v30 = vadd.f32 %v1166_v47, %v558_v13 }
 0x155   : > { %v694_v32 = vadd.f32 %v693_v22, %v559_v30 }
 0x156   : > { %v723_v17 = vpop.f32.mrf.mxu3 }
 0x157   : > { %735 = vst.msk [vmem:[%s1174_s13 + $0x40] sm:$0xff] %vm726_vm1, %v694_v32  ;;  %v724_v33 = vadd.f32 %v723_v17, %v589_v31 }
 0x159   : > { %745 = vst.msk [vmem:[%s1174_s13 + $0x90] sm:$0xff] %vm726_vm1, %v724_v33  ;;  %v711_v55 = vpop.f32.mrf.mxu2 }
 0x15a   : > { %v561_v34 = vpop.f32.mrf.mxu1 }
 0x15b   : > { %v562_v36 = vadd.f32 %v1166_v47, %v561_v34 }
 0x15d   : > { %v697_v37 = vadd.f32 %v696_v28, %v562_v36 }
 0x15f   : > { %736 = vst.msk [vmem:[%s1174_s13 + $0x48] sm:$0xff] %vm726_vm1, %v697_v37 }
 0x162   : > { %v564_v38 = vpop.f32.mrf.mxu1 }
 0x163   : > { %v565_v39 = vadd.f32 %v1166_v47, %v564_v38 }
 0x165   : > { %v700_v41 = vadd.f32 %v699_v35, %v565_v39 }
 0x167   : > { %737 = vst.msk [vmem:[%s1174_s13 + $0x50] sm:$0xff] %vm726_vm1, %v700_v41 }
 0x16a   : > { %v567_v42 = vpop.f32.mrf.mxu1 }
 0x16b   : > { %v568_v43 = vadd.f32 %v1166_v47, %v567_v42 }
 0x16d   : > { %v703_v44 = vadd.f32 %v702_v40, %v568_v43 }
 0x16f   : > { %738 = vst.msk [vmem:[%s1174_s13 + $0x58] sm:$0xff] %vm726_vm1, %v703_v44 }
 0x172   : > { %v570_v46 = vpop.f32.mrf.mxu1 }
 0x173   : > { %v571_v48 = vadd.f32 %v1166_v47, %v570_v46 }
 0x175   : > { %v706_v49 = vadd.f32 %v705_v45, %v571_v48 }
 0x177   : > { %739 = vst.msk [vmem:[%s1174_s13 + $0x60] sm:$0xff] %vm726_vm1, %v706_v49 }
 0x17a   : > { %v573_v51 = vpop.f32.mrf.mxu1 }
 0x17b   : > { %v574_v52 = vadd.f32 %v1166_v47, %v573_v51 }
 0x17d   : > { %v709_v53 = vadd.f32 %v708_v50, %v574_v52 }
 0x17f   : > { %740 = vst.msk [vmem:[%s1174_s13 + $0x68] sm:$0xff] %vm726_vm1, %v709_v53 }
 0x182   : > { %v576_v54 = vpop.f32.mrf.mxu1 }
 0x183   : > { %v577_v56 = vadd.f32 %v1166_v47, %v576_v54 }
 0x185   : > { %v712_v57 = vadd.f32 %v711_v55, %v577_v56 }
 0x187   : > { %741 = vst.msk [vmem:[%s1174_s13 + $0x70] sm:$0xff] %vm726_vm1, %v712_v57 }
 0x188 PF: > { %s16_s21 = sadd.s32 1, %s896_s21  }
 0x189   : > { %p13_p4 = scmp.ge.s32.totalorder %s16_s21, 4  }
 0x18b   :  { %15 = sbr.rel (!%p13_p4) target bundleno = 1 (0x1), region = 74 }

</bundles_post_ra>
